<compile_context>
chip_gen: v7x
topology: tpu7x:2x2x1
jax: 0.10.0
libtpu: 0.0.40
codegen_flags: <defaults>
</compile_context>

<pallas_src>
import jax
import jax.numpy as jnp
from jax.experimental import pallas as pl
from jax.experimental.pallas import tpu as pltpu


# ---------------------------------------------------------------------------
# Pallas kernel
# ---------------------------------------------------------------------------
def _vit_embed_kernel(p_ref, w_ref, addend_ref, out_ref):
    # p_ref:      (bR, K) bf16 — bR = block_batch*(N+1) flattened rows
    # w_ref:      (K,  E) bf16 — conv weight as a matmul (fetched once)
    # addend_ref: (bR, E) f32  — per-row additive term (cls/pos/bias), fetched once
    # out_ref:    (bR, E) out_dtype (bf16 by default)
    proj = jnp.dot(p_ref[...], w_ref[...], preferred_element_type=jnp.float32)
    out_ref[...] = (proj + addend_ref[...]).astype(out_ref.dtype)


def _vmem_limit_bytes():
    """Scoped VMEM limit: ~3/4 of physical, capped at 100 MiB.

    v5e/v6e (128 MiB physical) -> 96 MiB; v7x (64 MiB) -> 48 MiB.
    Conservative 64 MiB fallback if the query is unavailable.
    """
    phys = 64 * 1024 * 1024
    try:
        phys = int(pltpu.get_tpu_info().vmem_capacity_bytes)
    except Exception:
        pass
    return min(phys * 3 // 4, 100 * 1024 * 1024)


def _choose_block_batch(batch, rows, k_dim, e_dim, out_itemsize, vmem_budget,
                        target_rows=2048, min_steps=4):
    """Pick how many images to process per grid step.

    Constraints:
      * bb divides batch (blocks tile the batch exactly),
      * bb*rows is a multiple of 16 (bf16 sublane tile) unless bb == batch
        (full-dim blocks are always legal),
      * the per-step working set (inputs/outputs double-buffered, invariants
        conservatively counted double-buffered too) fits the VMEM budget.
    Preferences:
      * ~target_rows matmul rows per step (amortize ~0.35 us/step, fill the MXU),
      * >= min_steps grid steps when the batch allows (2 per TensorCore on v7x
        so prefetch/writeback overlaps compute).
    """
    def vmem_use(bb):
        br = bb * rows
        return (2 * br * k_dim * 2              # patches block, bf16, double-buffered
                + 2 * br * e_dim * out_itemsize  # output block, double-buffered
                + 2 * k_dim * e_dim * 2          # weight (invariant, counted x2)
                + 2 * br * e_dim * 4)            # addend f32 (invariant, counted x2)

    cands = [bb for bb in range(1, batch + 1)
             if batch % bb == 0
             and ((bb * rows) % 16 == 0 or bb == batch)
             and vmem_use(bb) <= vmem_budget]
    if not cands:  # theoretical corner (nothing fits); keep a legal block shape
        return 1 if (rows % 16 == 0 or batch == 1) else batch

    under = [bb for bb in cands if bb * rows <= target_rows]
    bb = max(under) if under else min(cands)
    while batch // bb < min_steps:
        smaller = [c for c in cands if c < bb]
        if not smaller:
            break
        bb = max(smaller)
    return bb


def vit_embed_pallas(patches_flat, w_bf16, addend_tiled, *, block_rows,
                     out_dtype, vmem_limit):
    """patches_flat: (M, K) bf16; w_bf16: (K, E) bf16; addend_tiled: (block_rows, E) f32."""
    M, K = patches_flat.shape
    E = w_bf16.shape[1]
    bR = block_rows
    assert M % bR == 0

    return pl.pallas_call(
        _vit_embed_kernel,
        out_shape=jax.ShapeDtypeStruct((M, E), out_dtype),
        grid_spec=pltpu.PrefetchScalarGridSpec(
            num_scalar_prefetch=0,
            grid=(M // bR,),
            in_specs=[
                pl.BlockSpec((bR, K), lambda b: (b, 0)),     # patch rows, per step
                pl.BlockSpec((K, E), lambda b: (0, 0)),      # invariant: fetched once
                pl.BlockSpec((bR, E), lambda b: (0, 0)),     # invariant: fetched once
            ],
            out_specs=pl.BlockSpec((bR, E), lambda b: (b, 0)),
        ),
        compiler_params=pltpu.CompilerParams(
            dimension_semantics=("parallel",),    # row blocks -> megacore / 2 TCs
            vmem_limit_bytes=int(vmem_limit),
        ),
    )(patches_flat, w_bf16, addend_tiled)


# ---------------------------------------------------------------------------
# Glue
# ---------------------------------------------------------------------------
def extract_patches_nchw(x, patch_size):
    """x: (B, C, H, W) -> (B, N_patches, C*P*P) with feature order (c, ph, pw)."""
    B, C, H, W = x.shape
    P = patch_size
    gh, gw = H // P, W // P
    x = x.reshape(B, C, gh, P, gw, P)
    # (B, gh, gw, C, P, P): patch index = gh-row * gw + gw-col (matches flatten(2))
    x = jnp.transpose(x, (0, 2, 4, 1, 3, 5))
    return x.reshape(B, gh * gw, C * P * P)


def vit_input_embedding(x, params, patch_size, *, out_dtype=jnp.bfloat16):
    """Forward pass matching ViTinputEmbedding.forward (dropout in eval = identity)."""
    conv_w = params["conv_w"]          # (E, C, P, P)  Conv2d weight layout
    conv_b = params["conv_b"]          # (E,)
    cls_token = params["cls_token"]    # (1, 1, E)
    pos_emb = params["pos_emb"]        # (1, N+1, E)

    E = conv_w.shape[0]
    B = x.shape[0]

    # bf16 before the unfold halves the HBM bytes of the transpose copy.
    patches = extract_patches_nchw(x.astype(jnp.bfloat16), patch_size)  # (B, N, K)
    N, K = patches.shape[1], patches.shape[2]
    ROWS = N + 1

    # One zero "patch" row per image: matmul row 0 is exactly 0 and the addend's
    # row 0 (cls + pos[0]) lands there -> dense full-block output stores, no
    # post-kernel concatenate.
    patches_ext = jnp.pad(patches, ((0, 0), (1, 0), (0, 0)))             # (B, ROWS, K)
    patches_flat = patches_ext.reshape(B * ROWS, K)                      # free reshape

    w_mat = conv_w.reshape(E, -1).T.astype(jnp.bfloat16)                 # (K, E) bf16

    # Fold conv bias + cls token + positional embedding into one f32 addend.
    extra = jnp.concatenate(
        [cls_token[0], jnp.broadcast_to(conv_b[None, :], (N, E))], axis=0)
    addend = (pos_emb[0] + extra).astype(jnp.float32)                    # (ROWS, E)

    vmem_limit = _vmem_limit_bytes()
    bB = _choose_block_batch(B, ROWS, K, E, jnp.dtype(out_dtype).itemsize,
                             vmem_budget=int(vmem_limit * 0.7))
    addend_tiled = jnp.tile(addend, (bB, 1))                             # (bB*ROWS, E)

    out_flat = vit_embed_pallas(patches_flat, w_mat, addend_tiled,
                                block_rows=bB * ROWS, out_dtype=out_dtype,
                                vmem_limit=vmem_limit)                   # (B*ROWS, E)
    # TODO(synk): dropout omitted (eval-mode identity); training-mode dropout would
    # need pltpu.prng_random_bits inside the kernel.
    return out_flat.reshape(B, ROWS, E)


def reference_forward(x, params, patch_size):
    """Plain-JAX f32 reference (conv via matmul) for correctness checking."""
    B = x.shape[0]
    E = params["conv_w"].shape[0]
    patches = extract_patches_nchw(x, patch_size)
    w_mat = params["conv_w"].reshape(E, -1).T
    proj = patches @ w_mat + params["conv_b"]                # (B, N, E)
    cls = jnp.broadcast_to(params["cls_token"], (B, 1, E))
    seq = jnp.concatenate([cls, proj], axis=1)
    return seq + params["pos_emb"]


# ---------------------------------------------------------------------------
# Demo / self-check
# ---------------------------------------------------------------------------
if __name__ == "__main__":
    # Small config consistent with the module:
    # image_size=16, patch_size=4, num_channels=4, hidden_dims=32 -> 16 patches.
    B, C, IMG, P, E = 2, 4, 16, 4, 32
    N = (IMG // P) * (IMG // P)

    key = jax.random.PRNGKey(0)
    k_x, k_w, k_b, k_cls, k_pos = jax.random.split(key, 5)

    x = jax.random.normal(k_x, (B, C, IMG, IMG), dtype=jnp.float32)

    # PyTorch inits cls_token / pos_emb to zeros; use small random values instead
    # so the adds are exercised (deterministic, in-script).
    params = {
        "conv_w": jax.random.normal(k_w, (E, C, P, P), dtype=jnp.float32) * 0.02,
        "conv_b": jax.random.normal(k_b, (E,), dtype=jnp.float32) * 0.02,
        "cls_token": jax.random.normal(k_cls, (1, 1, E), dtype=jnp.float32) * 0.02,
        "pos_emb": jax.random.normal(k_pos, (1, N + 1, E), dtype=jnp.float32) * 0.02,
    }

    fwd = jax.jit(vit_input_embedding, static_argnums=2)
    out = jax.block_until_ready(fwd(x, params, P))

    ref = reference_forward(x, params, P)
    assert out.shape == (B, N + 1, E), out.shape
    # bf16 matmul operands + bf16 output (f32 accumulate / epilogue): loosened tol.
    assert jnp.allclose(out.astype(jnp.float32), ref, atol=3e-2, rtol=3e-2), \
        "mismatch vs reference"

    print("KERNEL_OK")
</pallas_src>

<mosaic_0001>
module attributes {stable_mosaic.version = 11 : i64} {
  func.func @_vit_embed_kernel(%arg0: i32, %arg1: memref<34x64xbf16, #tpu.memory_space<vmem>>, %arg2: memref<64x32xbf16, #tpu.memory_space<vmem>>, %arg3: memref<34x32xf32, #tpu.memory_space<vmem>>, %arg4: memref<34x32xbf16, #tpu.memory_space<vmem>>) attributes {dimension_semantics = [#tpu.dimension_semantics<parallel>], iteration_bounds = array<i64: 1>, scalar_prefetch = 0 : i64, scratch_operands = 0 : i64, tpu.core_type = #tpu.core_type<tc>, window_params = [{transform_indices = @transform_0, window_bounds = array<i64: 34, 64>}, {pipeline_mode = #tpu.pipeline_mode<synchronous>, transform_indices = @transform_1, window_bounds = array<i64: 64, 32>}, {pipeline_mode = #tpu.pipeline_mode<synchronous>, transform_indices = @transform_2, window_bounds = array<i64: 34, 32>}, {transform_indices = @transform_3, window_bounds = array<i64: 34, 32>}]} {
    %c0 = arith.constant 0 : index
    %c0_0 = arith.constant 0 : index
    %0 = vector.load %arg1[%c0, %c0_0] : memref<34x64xbf16, #tpu.memory_space<vmem>>, vector<34x64xbf16>
    %c0_1 = arith.constant 0 : index
    %c0_2 = arith.constant 0 : index
    %1 = vector.load %arg2[%c0_1, %c0_2] : memref<64x32xbf16, #tpu.memory_space<vmem>>, vector<64x32xbf16>
    %cst = arith.constant dense<0.000000e+00> : vector<34x32xf32>
    %2 = tpu.matmul %0, %1, %cst {dimension_numbers = #tpu.dot_dimension_numbers<[1], [0], [0], [1], [0, 0, 1, 1], [], []>} : vector<34x64xbf16>, vector<64x32xbf16>, vector<34x32xf32> -> vector<34x32xf32>
    %c0_3 = arith.constant 0 : index
    %c0_4 = arith.constant 0 : index
    %3 = vector.load %arg3[%c0_3, %c0_4] : memref<34x32xf32, #tpu.memory_space<vmem>>, vector<34x32xf32>
    %4 = arith.addf %2, %3 : vector<34x32xf32>
    %5 = arith.truncf %4 : vector<34x32xf32> to vector<34x32xbf16>
    %c0_5 = arith.constant 0 : index
    %c0_6 = arith.constant 0 : index
    %6 = vector.load %arg4[%c0_5, %c0_6] : memref<34x32xbf16, #tpu.memory_space<vmem>>, vector<34x32xbf16>
    tpu.vector_store %arg4[%c0_5, %c0_6], %5 {strides = array<i32>} : memref<34x32xbf16, #tpu.memory_space<vmem>>, vector<34x32xbf16>,
    return
  }
  func.func @transform_0(%arg0: i32) -> (i32, i32) {
    %c0_i32 = arith.constant 0 : i32
    %c0_i32_0 = arith.constant 0 : i32
    return %arg0, %c0_i32 : i32, i32
  }
  func.func @transform_1(%arg0: i32) -> (i32, i32) {
    %c0_i32 = arith.constant 0 : i32
    %c0_i32_0 = arith.constant 0 : i32
    %c0_i32_1 = arith.constant 0 : i32
    return %c0_i32, %c0_i32_0 : i32, i32
  }
  func.func @transform_2(%arg0: i32) -> (i32, i32) {
    %c0_i32 = arith.constant 0 : i32
    %c0_i32_0 = arith.constant 0 : i32
    %c0_i32_1 = arith.constant 0 : i32
    return %c0_i32, %c0_i32_0 : i32, i32
  }
  func.func @transform_3(%arg0: i32) -> (i32, i32) {
    %c0_i32 = arith.constant 0 : i32
    %c0_i32_0 = arith.constant 0 : i32
    return %arg0, %c0_i32 : i32, i32
  }
}

</mosaic_0001>

<bundles_post_ra>
// kernel: tile.9
= control target key start
LH: loop header
LB: loop body
LE: loop exit
PB: predicated region body
PF: predicated region fallthrough
CT: control target
= control target key end

     0   :  { %vm3_vm0 = vcmask 261120   ;;  %s11_s6 = smov 3  ;;  %s74_s0 = inlined_call_operand.vmem [shape: f32[2,17,32], index: 0, kind: input, shape index: {}]   ;;  %s75_s1 = inlined_call_operand.vmem [shape: f32[34,32], index: 1, kind: output, shape index: {}]  }
   0x1   :  { %v2_v0 = vld [vmem:[%s74_s0] sm:$0xff]   ;;  %v26_v1 = vld [vmem:[%s74_s0 + $0x8] sm:$0xff]  }
   0x2   :  { %v28_v2 = vld [vmem:[%s74_s0 + $0x10] ss:$8 sm:%s11_s6]   ;;  %4 = vst.msk [vmem:[%s75_s1] sm:$0xff] %vm3_vm0, %v2_v0   ;;  %27 = vst.msk [vmem:[%s75_s1 + $0x8] sm:$0xff] %vm3_vm0, %v26_v1  }
   0x3   :  { %29 = vst.msk [vmem:[%s75_s1 + $0x10] sm:$0x3] %vm3_vm0, %v28_v2   ;;  %v30_v3 = vld [vmem:[%s74_s0 + $0x19] sm:$0xff]   ;;  %v32_v4 = vld [vmem:[%s74_s0 + $0x21] sm:$0xff]  }
   0x4   :  { %31 = vst.msk [vmem:[%s75_s1 + $0x12] sm:$0xff] %vm3_vm0, %v30_v3   ;;  %33 = vst.msk [vmem:[%s75_s1 + $0x1a] sm:$0xff] %vm3_vm0, %v32_v4  }

// kernel: vit_input_embedding.1
= control target key start
LH: loop header
LB: loop body
LE: loop exit
PB: predicated region body
PF: predicated region fallthrough
CT: control target
= control target key end

     0   :  { %v232_v0 = vmov 0.0   ;;  %vm233_vm0 = vmmov 0   ;;  %vm70_vm1 = vcmask 523264   ;;  %vm157_vm2 = vcmask 257024   ;;  %s308_s1 = inlined_call_operand.vmem [shape: bf16[64,32], index: 1, kind: input, shape index: {}]   ;;  %s309_s0 = inlined_call_operand.vmem [shape: bf16[34,64], index: 0, kind: input, shape index: {}]   ;;  %s310_s2 = inlined_call_operand.vmem [shape: f32[34,32], index: 2, kind: input, shape index: {}]   ;;  %s311_s3 = inlined_call_operand.vmem [shape: bf16[34,32], index: 3, kind: output, shape index: {}]  }
   0x1   :  { %215 = vmatprep.subr.bf16.mxu1 %v232_v0  ;;  %v225_v1 = vld [vmem:[%s308_s1] sm:$0xff]   ;;  %195 = vmatprep.subr.bf16.mxu0 %v232_v0  ;;  %v226_v2 = vld [vmem:[%s308_s1 + $0x8] sm:$0xff]   ;;  %v227_v3 = vld [vmem:[%s308_s1 + $0x10] sm:$0xff]   ;;  %vm162_vm3 = vcmask 253952  }
   0x2   :  { %207 = vmatprep.mubr.msk.bf16.mxu1 %vm233_vm0, %v232_v0  ;;  %203 = vmatprep.mubr.msk.bf16.mxu0 %vm233_vm0, %v232_v0  ;;  %v228_v4 = vld [vmem:[%s308_s1 + $0x18] sm:$0xff]   ;;  %v229_v5 = vld [vmem:[%s309_s0 + $0x8] sm:$0xff]   ;;  %v230_v6 = vld [vmem:[%s309_s0] sm:$0xff]  }
   0x3   :  { %219 = vmatpush3.bf16.msra.mxu1 %v225_v1  ;;  %196 = vmatpush3.bf16.msra.mxu0 %v225_v1  ;;  %v231_v7 = vld [vmem:[%s309_s0 + $0x10] ss:$0 sps:$4 sm:$0x11]   ;;  %v28_v9 = vld [vmem:[%s310_s2] sm:$0xff]  ;;  %v31_v11 = vld [vmem:[%s310_s2 + $0x18] sm:$0xff] }
   0x4   :  { %216 = vmatprep.subr.bf16.mxu1 %v232_v0  ;;  %197 = vmatprep.subr.bf16.mxu0 %v232_v0  ;;  %v30_v8 = vld [vmem:[%s310_s2 + $0x10] sm:$0xff]  ;;  %v29_v13 = vld [vmem:[%s310_s2 + $0x8] sm:$0xff]  ;;  %v32_v28 = vld [vmem:[%s310_s2 + $0x20] sm:$0x3] }
   0x7   :  { %220 = vmatpush3.bf16.msra.mxu1 %v226_v2  ;;  %198 = vmatpush3.bf16.msra.mxu0 %v226_v2 }
   0x8   :  { %217 = vmatprep.subr.bf16.mxu1 %v232_v0  ;;  %199 = vmatprep.subr.bf16.mxu0 %v232_v0 }
   0xb   :  { %221 = vmatpush3.bf16.msra.mxu1 %v227_v3  ;;  %200 = vmatpush3.bf16.msra.mxu0 %v227_v3 }
   0xc   :  { %218 = vmatprep.subr.bf16.mxu1 %v232_v0  ;;  %201 = vmatprep.subr.bf16.mxu0 %v232_v0 }
   0xf   :  { %222 = vmatpush3.bf16.msra.mxu1 %v228_v4  ;;  %202 = vmatpush3.bf16.msra.mxu0 %v228_v4 }
  0x12   :  { %208 = vmatmul.mubr.msk.bf16.vlgmr.msra.gmra.mrb[0].mxu1 %vm70_vm1, %v229_v5  ;;  %204 = vmatmul.mubr.msk.bf16.vlgmr.msra.gmra.mrb[0].mxu0 %vm70_vm1, %v230_v6 }
  0x13   :  { %211 = vmatprep.mubr.msk.bf16.mxu1 %vm233_vm0, %v232_v0 }
  0x1a   :  { %212 = vmatmul.mubr.msk.bf16.gmra.mrb[4].mxu1 %vm70_vm1, %v231_v7 }
  0xe5   :  { %v122_v10 = vpop.f32.mrb[0].mxu1  ;;  %v114_v12 = vpop.f32.mrb[0].mxu0 }
  0xe6   :  { %v123_v14 = vadd.f32 %v122_v10, %v30_v8  ;;  %v209_v15 = vpop.f32.mrb[1].mxu1  ;;  %v115_v16 = vadd.f32 %v114_v12, %v28_v9  ;;  %v205_v17 = vpop.f32.mrb[1].mxu0 }
  0xe7   :  { %v125_v18 = vpop.f32.mrb[2].mxu1  ;;  %v117_v19 = vpop.f32.mrb[2].mxu0 }
  0xe8   :  { %v185_v20 = vpack.c.bf16 %v123_v14, %v123_v14  ;;  %v126_v21 = vadd.f32 %v125_v18, %v31_v11  ;;  %v183_v22 = vpack.c.bf16 %v115_v16, %v115_v16  ;;  %v210_v23 = vpop.f32.mrb[3].mxu1  ;;  %v118_v24 = vadd.f32 %v117_v19, %v29_v13  ;;  %v206_v25 = vpop.f32.mrb[3].mxu0 }
  0xea   :  { %160 = vst.msk [vmem:[%s311_s3 + $0x8] sm:$0xf] %vm157_vm2, %v185_v20  ;;  %v186_v26 = vpack.c.bf16 %v126_v21, %v126_v21  ;;  %158 = vst.msk [vmem:[%s311_s3] sm:$0xf] %vm157_vm2, %v183_v22  ;;  %v184_v27 = vpack.c.bf16 %v118_v24, %v118_v24 }
  0xec   :  { %161 = vst.msk [vmem:[%s311_s3 + $0xc] sm:$0xf] %vm157_vm2, %v186_v26  ;;  %159 = vst.msk [vmem:[%s311_s3 + $0x4] sm:$0xf] %vm157_vm2, %v184_v27 }
  0xed   :  { %v130_v29 = vpop.f32.mrb[4].mxu1 }
  0xee   :  { %v131_v30 = vadd.f32 %v130_v29, %v32_v28  ;;  %v213_v31 = vpop.f32.mrb[5].mxu1 }
  0xef   :  { %v133_v32 = vpop.f32.mrb[6].mxu1 }
  0xf0   :  { %v187_v33 = vpack.c.bf16 %v131_v30, %v131_v30  ;;  %v214_v34 = vpop.f32.mrb[7].mxu1 }
  0xf2   :  { %163 = vst.msk [vmem:[%s311_s3 + $0x10] sm:$0x1] %vm162_vm3, %v187_v33 }

</bundles_post_ra>
